<compile_context>
chip_gen: v5e
topology: v5e:2x2
jax: 0.10.0
libtpu: 0.0.40
codegen_flags: <defaults>
</compile_context>

<pallas_src>
import functools

import jax
import jax.numpy as jnp
from jax.experimental import pallas as pl
from jax.experimental.pallas import tpu as pltpu


def _merge_tile(w_ref, c_ref):
    """merged[k, n] = sum_m c[k, m] * W_m[k, n], accumulated in f32.

    w_ref: (num_models, tk, tn) block of the (K, N)-layout weights.
    c_ref: (tk, num_models) block of pre-tanh'ed, transposed merger coefficients (f32).
    """
    num_models = w_ref.shape[0]
    merged = c_ref[:, 0:1] * w_ref[0].astype(jnp.float32)
    for m in range(1, num_models):  # static, tiny loop (num_models == 3)
        merged = merged + c_ref[:, m:m + 1] * w_ref[m].astype(jnp.float32)
    return merged


def _dam_kernel_f32(x_ref, w_ref, c_ref, o_ref):
    """f32 output: accumulate straight into the VMEM-resident output block."""
    merged = _merge_tile(w_ref, c_ref)
    contrib = jnp.dot(
        x_ref[...], merged.astype(x_ref.dtype), preferred_element_type=jnp.float32
    )
    k = pl.program_id(2)

    @pl.when(k == 0)
    def _init():
        o_ref[...] = contrib

    @pl.when(k > 0)
    def _accum():
        o_ref[...] += contrib


def _dam_kernel_acc(x_ref, w_ref, c_ref, o_ref, acc_ref):
    """Non-f32 output: accumulate in an f32 scratch, cast once at the end."""
    merged = _merge_tile(w_ref, c_ref)
    contrib = jnp.dot(
        x_ref[...], merged.astype(x_ref.dtype), preferred_element_type=jnp.float32
    )
    k = pl.program_id(2)

    @pl.when(k == 0)
    def _init():
        acc_ref[...] = contrib

    @pl.when(k > 0)
    def _accum():
        acc_ref[...] += contrib

    @pl.when(k == pl.num_programs(2) - 1)
    def _finalize():
        o_ref[...] = acc_ref[...].astype(o_ref.dtype)


@functools.partial(jax.jit, static_argnames=("tn", "tk", "tm_cap"))
def dam_linear_forward(hidden_states, weights, mergers, *, tn=256, tk=256, tm_cap=256):
    """hidden_states: (B, S, K) -> (B, S, N).

    weights: (num_models, N, K)  (PyTorch F.linear layout)
    mergers: (num_models, K)
    """
    B, S, K = hidden_states.shape
    num_models, N, K2 = weights.shape
    assert K == K2 and mergers.shape == (num_models, K)

    # Hoist the non-linearity and layout work out of the kernel.
    coeffs_t = jnp.tanh(mergers.astype(jnp.float32)).T        # (K, num_models), f32
    weights_t = jnp.transpose(weights, (0, 2, 1))              # (num_models, K, N)

    x2d = hidden_states.reshape(B * S, K)
    M = B * S

    tn = min(tn, N)
    tk = min(tk, K)
    assert N % tn == 0 and K % tk == 0, "N and K must be multiples of the tile sizes"

    # Pick tm and pad M: single block if it fits under the cap, else cap and pad to
    # a multiple of tm (keeps x tile + output block bounded, incl. v7x 64 MiB VMEM).
    m_pad8 = ((M + 7) // 8) * 8
    if m_pad8 <= tm_cap:
        tm = m_pad8
        m_padded = m_pad8
    else:
        tm = tm_cap
        m_padded = ((m_pad8 + tm - 1) // tm) * tm
    if m_padded != M:
        x2d = jnp.pad(x2d, ((0, m_padded - M), (0, 0)))

    grid = (m_padded // tm, N // tn, K // tk)

    out_dtype = hidden_states.dtype
    if out_dtype == jnp.float32:
        kernel = _dam_kernel_f32
        scratch_shapes = []
    else:
        kernel = _dam_kernel_acc
        scratch_shapes = [pltpu.VMEM((tm, tn), jnp.float32)]

    # Explicit VMEM budget (double-buffered inputs + output block + scratch), headroom.
    x_isz = x2d.dtype.itemsize
    w_isz = weights_t.dtype.itemsize
    o_isz = jnp.dtype(out_dtype).itemsize
    vmem_estimate = (
        2 * num_models * tk * tn * w_isz      # weight blocks (largest DMA)
        + 2 * tm * tk * x_isz                 # x blocks
        + 2 * tk * 128 * 4                    # coeff blocks (lane-padded)
        + 2 * tm * tn * o_isz                 # output block
        + tm * tn * 4                         # f32 scratch accumulator (if present)
    )
    vmem_limit = int(min(max(2 * vmem_estimate, 32 * 1024 * 1024), 48 * 1024 * 1024))

    in_specs = [
        pl.BlockSpec((tm, tk), lambda i, j, k: (i, k)),
        pl.BlockSpec((num_models, tk, tn), lambda i, j, k: (0, k, j)),
        pl.BlockSpec((tk, num_models), lambda i, j, k: (k, 0)),
    ]
    out_spec = pl.BlockSpec((tm, tn), lambda i, j, k: (i, j))

    out2d = pl.pallas_call(
        kernel,
        out_shape=jax.ShapeDtypeStruct((m_padded, N), out_dtype),
        grid_spec=pltpu.PrefetchScalarGridSpec(
            num_scalar_prefetch=0,
            grid=grid,
            in_specs=in_specs,
            out_specs=out_spec,
            scratch_shapes=scratch_shapes,
        ),
        compiler_params=pltpu.CompilerParams(
            dimension_semantics=("parallel", "parallel", "arbitrary"),
            vmem_limit_bytes=vmem_limit,
        ),
    )(x2d, weights_t, coeffs_t)

    # TODO(synk): bias=True path (per-model biases + scalar bias_mergers) and the
    # model_index selection path are not implemented; module defaults are bias=False,
    # model_index=None.  For very large M (prefill) a two-pass scheme (materialize
    # merged_W to HBM once, then a plain matmul) avoids re-streaming 3*K*N weights
    # per M-block.
    return out2d[:M].reshape(B, S, N)


def _reference(hidden_states, weights, mergers):
    # Pure-JAX reference of the PyTorch forward (model_index=None, tanh, no bias).
    merged_w = jnp.sum(jnp.tanh(mergers)[:, None, :] * weights, axis=0)  # (N, K)
    return jnp.einsum("bsk,nk->bsn", hidden_states, merged_w)


if __name__ == "__main__":
    # Small shapes consistent with the module: batch=2, seq=8, in=256, out=256.
    batch, seq = 2, 8
    in_features, out_features, num_models = 256, 256, 3

    key = jax.random.PRNGKey(0)
    kx, kw = jax.random.split(key)

    hidden_states = jax.random.normal(
        kx, (batch, seq, in_features), dtype=jnp.float32
    )
    # Module init uses zero weights (a checkpoint would fill them); use deterministic
    # random values here so the matmul is non-trivial.
    weights = (
        jax.random.normal(
            kw, (num_models, out_features, in_features), dtype=jnp.float32
        )
        * 0.02
    )
    # mergers initialized exactly like the module: ones * (1 / num_models)
    mergers = jnp.ones((num_models, in_features), dtype=jnp.float32) / num_models

    out = dam_linear_forward(hidden_states, weights, mergers)
    out = jax.block_until_ready(out)

    ref = _reference(hidden_states, weights, mergers)
    assert out.shape == (batch, seq, out_features)
    assert jnp.allclose(out, ref, atol=1e-4, rtol=1e-4), (
        float(jnp.max(jnp.abs(out - ref)))
    )
    print("KERNEL_OK")
</pallas_src>

<mosaic_0001>
module attributes {stable_mosaic.version = 11 : i64} {
  func.func @_dam_kernel_f32(%arg0: i32, %arg1: i32, %arg2: i32, %arg3: memref<16x256xf32, #tpu.memory_space<vmem>>, %arg4: memref<3x256x256xf32, #tpu.memory_space<vmem>>, %arg5: memref<256x3xf32, #tpu.memory_space<vmem>>, %arg6: memref<16x256xf32, #tpu.memory_space<vmem>>) attributes {dimension_semantics = [#tpu.dimension_semantics<parallel>, #tpu.dimension_semantics<parallel>, #tpu.dimension_semantics<arbitrary>], iteration_bounds = array<i64: 1, 1, 1>, scalar_prefetch = 0 : i64, scratch_operands = 0 : i64, tpu.core_type = #tpu.core_type<tc>, window_params = [{transform_indices = @transform_0, window_bounds = array<i64: 16, 256>}, {transform_indices = @transform_1, window_bounds = array<i64: 3, 256, 256>}, {transform_indices = @transform_2, window_bounds = array<i64: 256, 3>}, {transform_indices = @transform_3, window_bounds = array<i64: 16, 256>}]} {
    %c0 = arith.constant 0 : index
    %c0_0 = arith.constant 0 : index
    %0 = vector.load %arg5[%c0, %c0_0] : memref<256x3xf32, #tpu.memory_space<vmem>>, vector<256x1xf32>
    %c0_1 = arith.constant 0 : index
    %c0_2 = arith.constant 0 : index
    %c0_3 = arith.constant 0 : index
    %1 = vector.load %arg4[%c0_1, %c0_2, %c0_3] : memref<3x256x256xf32, #tpu.memory_space<vmem>>, vector<1x256x256xf32>
    %2 = vector.shape_cast %1 : vector<1x256x256xf32> to vector<256x256xf32>
    %3 = vector.broadcast %0 : vector<256x1xf32> to vector<256x256xf32>
    %4 = arith.mulf %3, %2 : vector<256x256xf32>
    %c0_4 = arith.constant 0 : index
    %c1 = arith.constant 1 : index
    %5 = vector.load %arg5[%c0_4, %c1] : memref<256x3xf32, #tpu.memory_space<vmem>>, vector<256x1xf32>
    %c1_5 = arith.constant 1 : index
    %c0_6 = arith.constant 0 : index
    %c0_7 = arith.constant 0 : index
    %6 = vector.load %arg4[%c1_5, %c0_6, %c0_7] : memref<3x256x256xf32, #tpu.memory_space<vmem>>, vector<1x256x256xf32>
    %7 = vector.shape_cast %6 : vector<1x256x256xf32> to vector<256x256xf32>
    %8 = vector.broadcast %5 : vector<256x1xf32> to vector<256x256xf32>
    %9 = arith.mulf %8, %7 : vector<256x256xf32>
    %10 = arith.addf %4, %9 : vector<256x256xf32>
    %c0_8 = arith.constant 0 : index
    %c2 = arith.constant 2 : index
    %11 = vector.load %arg5[%c0_8, %c2] : memref<256x3xf32, #tpu.memory_space<vmem>>, vector<256x1xf32>
    %c2_9 = arith.constant 2 : index
    %c0_10 = arith.constant 0 : index
    %c0_11 = arith.constant 0 : index
    %12 = vector.load %arg4[%c2_9, %c0_10, %c0_11] : memref<3x256x256xf32, #tpu.memory_space<vmem>>, vector<1x256x256xf32>
    %13 = vector.shape_cast %12 : vector<1x256x256xf32> to vector<256x256xf32>
    %14 = vector.broadcast %11 : vector<256x1xf32> to vector<256x256xf32>
    %15 = arith.mulf %14, %13 : vector<256x256xf32>
    %16 = arith.addf %10, %15 : vector<256x256xf32>
    %c0_12 = arith.constant 0 : index
    %c0_13 = arith.constant 0 : index
    %17 = vector.load %arg3[%c0_12, %c0_13] : memref<16x256xf32, #tpu.memory_space<vmem>>, vector<16x256xf32>
    %cst = arith.constant dense<0.000000e+00> : vector<16x256xf32>
    %18 = tpu.matmul %17, %16, %cst {dimension_numbers = #tpu.dot_dimension_numbers<[1], [0], [0], [1], [0, 0, 1, 1], [], []>} : vector<16x256xf32>, vector<256x256xf32>, vector<16x256xf32> -> vector<16x256xf32>
    %c0_i32 = arith.constant 0 : i32
    %19 = arith.cmpi eq, %arg2, %c0_i32 : i32
    %20 = arith.extui %19 : i1 to i32
    %c0_i32_14 = arith.constant 0 : i32
    %21 = arith.cmpi ne, %20, %c0_i32_14 : i32
    scf.if %21 {
      %c0_17 = arith.constant 0 : index
      %c0_18 = arith.constant 0 : index
      %25 = vector.load %arg6[%c0_17, %c0_18] : memref<16x256xf32, #tpu.memory_space<vmem>>, vector<16x256xf32>
      tpu.vector_store %arg6[%c0_17, %c0_18], %18 {strides = array<i32>} : memref<16x256xf32, #tpu.memory_space<vmem>>, vector<16x256xf32>,
    } else {
    }
    %c0_i32_15 = arith.constant 0 : i32
    %22 = arith.cmpi sgt, %arg2, %c0_i32_15 : i32
    %23 = arith.extui %22 : i1 to i32
    %c0_i32_16 = arith.constant 0 : i32
    %24 = arith.cmpi ne, %23, %c0_i32_16 : i32
    scf.if %24 {
      %c0_17 = arith.constant 0 : index
      %c0_18 = arith.constant 0 : index
      %25 = vector.load %arg6[%c0_17, %c0_18] : memref<16x256xf32, #tpu.memory_space<vmem>>, vector<16x256xf32>
      %26 = arith.addf %25, %18 : vector<16x256xf32>
      %c0_19 = arith.constant 0 : index
      %c0_20 = arith.constant 0 : index
      %27 = vector.load %arg6[%c0_19, %c0_20] : memref<16x256xf32, #tpu.memory_space<vmem>>, vector<16x256xf32>
      tpu.vector_store %arg6[%c0_19, %c0_20], %26 {strides = array<i32>} : memref<16x256xf32, #tpu.memory_space<vmem>>, vector<16x256xf32>,
    } else {
    }
    return
  }
  func.func @transform_0(%arg0: i32, %arg1: i32, %arg2: i32) -> (i32, i32) {
    %c0_i32 = arith.constant 0 : i32
    return %arg0, %arg2 : i32, i32
  }
  func.func @transform_1(%arg0: i32, %arg1: i32, %arg2: i32) -> (i32, i32, i32) {
    %c0_i32 = arith.constant 0 : i32
    %c0_i32_0 = arith.constant 0 : i32
    return %c0_i32, %arg2, %arg1 : i32, i32, i32
  }
  func.func @transform_2(%arg0: i32, %arg1: i32, %arg2: i32) -> (i32, i32) {
    %c0_i32 = arith.constant 0 : i32
    %c0_i32_0 = arith.constant 0 : i32
    return %arg2, %c0_i32 : i32, i32
  }
  func.func @transform_3(%arg0: i32, %arg1: i32, %arg2: i32) -> (i32, i32) {
    %c0_i32 = arith.constant 0 : i32
    return %arg0, %arg1 : i32, i32
  }
}

</mosaic_0001>

<bundles_post_ra>
// kernel: dam_linear_forward.1
= control target key start
LH: loop header
LB: loop body
LE: loop exit
PB: predicated region body
PF: predicated region fallthrough
CT: control target
= control target key end

     0   :  { %v1284_v3 = vmov 0   ;;  %s2457_s0 = inlined_call_operand.vmem [shape: f32[16,256], index: 0, kind: input, shape index: {}]   ;;  %s2458_s1 = inlined_call_operand.vmem [shape: f32[3,256,256], index: 1, kind: input, shape index: {}]   ;;  %s2459_s2 = inlined_call_operand.vmem [shape: f32[256,3], index: 2, kind: input, shape index: {}]   ;;  %s2460_s3 = inlined_call_operand.hbm [shape: f32[16,256], index: 3, kind: output, shape index: {}]  }
   0x1   :  { %v1313_v0 = vld [vmem:[%s2459_s2 + $0x20] sm:$0xff]  ;;  %v1318_v1 = vld [vmem:[%s2459_s2 + $0x10] sm:$0xff]  ;;  %1251 = vset.pattern.permute.xlu2 %v1284_v3  ;;  %1250 = vset.pattern.permute.xlu1 %v1284_v3 }
   0x2   :  { %v1323_v2 = vld [vmem:[%s2459_s2] sm:$0xff]  ;;  %1249 = vset.pattern.permute.xlu0 %v1284_v3  ;;  %133 = vperm.xlu2 %1251, %v1313_v0  }
   0x3   :  { %2470 = vst [vmem:[#allocation5_spill] sm:$0xff] %v1323_v2  ;;  %123 = vperm.xlu1 %1250, %v1318_v1   ;;  %113 = vperm.xlu0 %1249, %v1323_v2  }
   0x4   :  { %8 = vsyncpa [#allocation3], 0  ;;  %v1331_v4 = vld [vmem:[%s2459_s2 + $0x28] sm:$0xff]  ;;  %v1336_v5 = vld [vmem:[%s2459_s2 + $0x18] sm:$0xff]  ;;  %v1285_v33 = vmov 1   ;;  %v1286_v60 = vmov 2  }
   0x5   :  { %v1341_v6 = vld [vmem:[%s2459_s2 + $0x8] sm:$0xff]  ;;  %v1349_v7 = vld [vmem:[%s2459_s2 + $0x40] sm:$0xff]  ;;  %v1354_v8 = vld [vmem:[%s2459_s2 + $0x38] sm:$0xff]  ;;  %s1287_s21 = smov [#allocation2]   ;;  %s1288_s24 = smov 256  }
   0x6   :  { %v1359_v9 = vld [vmem:[%s2459_s2 + $0x30] sm:$0xff]  ;;  %v1367_v10 = vld [vmem:[%s2459_s2 + $0x58] sm:$0xff]  ;;  %v1377_v12 = vld [vmem:[%s2459_s2 + $0x48] sm:$0xff]  ;;  %s1289_s25 = smov 16  }
   0x7   :  { %v1372_v11 = vld [vmem:[%s2459_s2 + $0x50] sm:$0xff]  ;;  %v1390_v14 = vld [vmem:[%s2459_s2 + $0x68] sm:$0xff]  ;;  %v1395_v15 = vld [vmem:[%s2459_s2 + $0x60] sm:$0xff] }
   0x8   :  { %v1385_v13 = vld [vmem:[%s2459_s2 + $0x70] sm:$0xff]  ;;  %v1403_v16 = vld [vmem:[%s2459_s2 + $0x88] sm:$0xff]  ;;  %v1408_v17 = vld [vmem:[%s2459_s2 + $0x80] sm:$0xff] }
   0x9   :  { %2471 = vst [vmem:[#allocation6_spill] sm:$0xff] %v1403_v16  ;;  %v1413_v18 = vld [vmem:[%s2459_s2 + $0x78] sm:$0xff]  ;;  %v1421_v19 = vld [vmem:[%s2459_s2 + $0xa0] sm:$0xff]  ;;  %v1431_v21 = vld [vmem:[%s2459_s2 + $0x90] sm:$0xff] }
   0xa   :  { %138 = vperm.xlu2 %1251, %v1331_v4   ;;  %v1426_v20 = vld [vmem:[%s2459_s2 + $0x98] sm:$0xff]  ;;  %2472 = vst [vmem:[#allocation7_spill] sm:$0xff] %v1431_v21  ;;  %v1444_v23 = vld [vmem:[%s2459_s2 + $0xb0] sm:$0xff]  ;;  %v1449_v24 = vld [vmem:[%s2459_s2 + $0xa8] sm:$0xff] }
   0xb   :  { %128 = vperm.xlu1 %1250, %v1336_v5   ;;  %118 = vperm.xlu0 %1249, %v1341_v6   ;;  %v1439_v22 = vld [vmem:[%s2459_s2 + $0xb8] sm:$0xff]  ;;  %v1457_v25 = vld [vmem:[%s2459_s2 + $0xd0] sm:$0xff]  ;;  %v1462_v26 = vld [vmem:[%s2459_s2 + $0xc8] sm:$0xff] }
   0xc   :  { %v1467_v27 = vld [vmem:[%s2459_s2 + $0xc0] sm:$0xff]  ;;  %v1475_v28 = vld [vmem:[%s2459_s2 + $0xe8] sm:$0xff]  ;;  %v1485_v30 = vld [vmem:[%s2459_s2 + $0xd8] sm:$0xff] }
   0xd   :  { %v1480_v29 = vld [vmem:[%s2459_s2 + $0xe0] sm:$0xff]  ;;  %v1493_v31 = vld [vmem:[%s2459_s2 + $0xf8] sm:$0xff]  ;;  %v1498_v32 = vld [vmem:[%s2459_s2 + $0xf0] sm:$0xff]  ;;  %s1101_s2 = sshll.u32 %s1287_s21, 4  ;;  %s1102_s2 = int_to_ptr.vmem [resolvable:$true] %s1101_s2 }
   0xe   :  { %v47_v58 = vld [vmem:[%s2458_s1] sm:$0xff]  ;;  %v48_v59 = vld [vmem:[%s2458_s1 + $0x8] sm:$0xff] }
   0xf   :  { %v1115_v61 = vld [vmem:[%s2458_s1 + $0x200] sm:$0xff]  ;;  %v1116_v62 = vld [vmem:[%s2458_s1 + $0x208] sm:$0xff] }
  0x12   :  { %153 = vperm.xlu2 %1251, %v1349_v7  }
  0x13   :  { %148 = vperm.xlu1 %1250, %v1354_v8   ;;  %143 = vperm.xlu0 %1249, %v1359_v9  }
  0x1a   :  { %168 = vperm.xlu2 %1251, %v1367_v10  }
  0x1b   :  { %163 = vperm.xlu1 %1250, %v1372_v11   ;;  %158 = vperm.xlu0 %1249, %v1377_v12  }
  0x22   :  { %183 = vperm.xlu2 %1251, %v1385_v13  }
  0x23   :  { %178 = vperm.xlu1 %1250, %v1390_v14   ;;  %173 = vperm.xlu0 %1249, %v1395_v15  }
  0x2a   :  { %198 = vperm.xlu2 %1251, %v1403_v16  }
  0x2b   :  { %193 = vperm.xlu1 %1250, %v1408_v17   ;;  %188 = vperm.xlu0 %1249, %v1413_v18  }
  0x32   :  { %213 = vperm.xlu2 %1251, %v1421_v19  }
  0x33   :  { %208 = vperm.xlu1 %1250, %v1426_v20   ;;  %203 = vperm.xlu0 %1249, %v1431_v21  }
  0x3a   :  { %228 = vperm.xlu2 %1251, %v1439_v22  }
  0x3b   :  { %223 = vperm.xlu1 %1250, %v1444_v23   ;;  %218 = vperm.xlu0 %1249, %v1449_v24  }
  0x42   :  { %243 = vperm.xlu2 %1251, %v1457_v25  }
  0x43   :  { %238 = vperm.xlu1 %1250, %v1462_v26   ;;  %233 = vperm.xlu0 %1249, %v1467_v27  }
  0x4a   :  { %258 = vperm.xlu2 %1251, %v1475_v28  }
  0x4b   :  { %253 = vperm.xlu1 %1250, %v1480_v29   ;;  %248 = vperm.xlu0 %1249, %v1485_v30  }
  0x52   :  { %1252 = vset.pattern.permute.xlu2 %v1285_v33 }
  0x53   :  { %268 = vperm.xlu1 %1250, %v1493_v31   ;;  %263 = vperm.xlu0 %1249, %v1498_v32  }
  0x54   :  { %401 = vperm.xlu2 %1252, %v1323_v2  }
  0x5b   :  { %1254 = vset.pattern.permute.xlu1 %v1285_v33  ;;  %1253 = vset.pattern.permute.xlu0 %v1285_v33 }
  0x5c   :  { %409 = vperm.xlu1 %1254, %v1318_v1   ;;  %413 = vperm.xlu2 %1252, %v1336_v5   ;;  %v1505_v34 = vpop.permute.xlu2 %133 }
  0x5d   :  { %405 = vperm.xlu0 %1253, %v1341_v6  }
  0x64   :  { %417 = vperm.xlu1 %1254, %v1313_v0   ;;  %421 = vperm.xlu2 %1252, %v1331_v4   ;;  %v1510_v35 = vpop.permute.xlu2 %138 }
  0x65   :  { %425 = vperm.xlu0 %1253, %v1359_v9  }
  0x6c   :  { %429 = vperm.xlu1 %1254, %v1354_v8   ;;  %433 = vperm.xlu2 %1252, %v1349_v7   ;;  %v1515_v36 = vpop.permute.xlu2 %153 }
  0x6d   :  { %437 = vperm.xlu0 %1253, %v1377_v12  }
  0x74   :  { %441 = vperm.xlu1 %1254, %v1372_v11   ;;  %445 = vperm.xlu2 %1252, %v1367_v10   ;;  %v1520_v37 = vpop.permute.xlu2 %168 }
  0x75   :  { %449 = vperm.xlu0 %1253, %v1395_v15   ;;  %v1523_v38 = vpop.permute.xlu1 %123  ;;  %v114_v39 = vpop.permute.xlu0 %113 }
  0x7c   :  { %453 = vperm.xlu1 %1254, %v1390_v14   ;;  %457 = vperm.xlu2 %1252, %v1385_v13   ;;  %v1527_v40 = vpop.permute.xlu2 %183 }
  0x7d   :  { %461 = vperm.xlu0 %1253, %v1413_v18   ;;  %v1530_v41 = vpop.permute.xlu1 %128  ;;  %v1532_v42 = vpop.permute.xlu0 %118 }
  0x84   :  { %465 = vperm.xlu1 %1254, %v1408_v17   ;;  %469 = vperm.xlu2 %1252, %v1403_v16   ;;  %v1536_v43 = vpop.permute.xlu2 %198 }
  0x85   :  { %473 = vperm.xlu0 %1253, %v1431_v21   ;;  %v1539_v44 = vpop.permute.xlu1 %148  ;;  %v1541_v45 = vpop.permute.xlu0 %143  ;;  %v53_v21 = vld [vmem:[%s2458_s1 + $0x30] sm:$0xff] }
  0x8c   :  { %477 = vperm.xlu1 %1254, %v1426_v20   ;;  %481 = vperm.xlu2 %1252, %v1421_v19   ;;  %v1545_v46 = vpop.permute.xlu2 %213 }
  0x8d   :  { %485 = vperm.xlu0 %1253, %v1449_v24   ;;  %v1548_v47 = vpop.permute.xlu1 %163  ;;  %v1550_v48 = vpop.permute.xlu0 %158 }
  0x94   :  { %489 = vperm.xlu1 %1254, %v1444_v23   ;;  %493 = vperm.xlu2 %1252, %v1439_v22   ;;  %v1554_v49 = vpop.permute.xlu2 %228 }
  0x95   :  { %497 = vperm.xlu0 %1253, %v1467_v27   ;;  %v1557_v50 = vpop.permute.xlu1 %178  ;;  %v1559_v51 = vpop.permute.xlu0 %173 }
  0x96   :  { %2473 = vst [vmem:[#allocation8_spill] sm:$0xff] %v1557_v50  ;;  %v271_v50 = vmul.f32 %v114_v39, %v47_v58 }
  0x9c   :  { %501 = vperm.xlu1 %1254, %v1462_v26   ;;  %505 = vperm.xlu2 %1252, %v1457_v25   ;;  %v1563_v52 = vpop.permute.xlu2 %243 }
  0x9d   :  { %509 = vperm.xlu0 %1253, %v1485_v30   ;;  %v1566_v53 = vpop.permute.xlu1 %193  ;;  %v1568_v54 = vpop.permute.xlu0 %188 }
  0x9e   :  { %2474 = vst [vmem:[#allocation9_spill] sm:$0xff] %v1568_v54 }
  0xa4   :  { %525 = vperm.xlu1 %1254, %v1493_v31   ;;  %521 = vperm.xlu2 %1252, %v1498_v32   ;;  %v1572_v55 = vpop.permute.xlu2 %258 }
  0xa5   :  { %2475 = vst [vmem:[#allocation10_spill] sm:$0xff] %v1572_v55  ;;  %513 = vperm.xlu0 %1253, %v1480_v29   ;;  %v1575_v56 = vpop.permute.xlu1 %208  ;;  %v1577_v57 = vpop.permute.xlu0 %203  ;;  %v272_v55 = vmul.f32 %v114_v39, %v48_v59  ;;  %v1122_v39 = vld [vmem:[%s2458_s1 + $0x238] sm:$0xff] }
  0xa6   :  { %2476 = vst [vmem:[#allocation11_spill] sm:$0xff] %v1575_v56 }
  0xac   :  { %1255 = vset.pattern.permute.xlu1 %v1286_v60  ;;  %517 = vperm.xlu2 %1252, %v1475_v28  }
  0xad   :  { %1257 = vset.pattern.permute.xlu0 %v1286_v60  ;;  %846 = vperm.xlu1 %1255, %v1493_v31   ;;  %v1593_v63 = vpop.permute.xlu1 %223  ;;  %v1595_v3 = vpop.permute.xlu0 %218  ;;  %v54_v31 = vld [vmem:[%s2458_s1 + $0x38] sm:$0xff] }
  0xae   :  { %782 = vperm.xlu0 %1257, %v1413_v18   ;;  %v402_v33 = vpop.permute.xlu2 %401  ;;  %v1121_v18 = vld [vmem:[%s2458_s1 + $0x230] sm:$0xff]  ;;  %v278_v58 = vmul.f32 %v1530_v41, %v54_v31 }
  0xaf   :  { %v528_v54 = vmul.f32 %v1115_v61, %v402_v33  ;;  %v529_v2 = vmul.f32 %v1116_v62, %v402_v33 }
  0xb1   :  { %v1598_v16 = vadd.f32 %v528_v54, %v271_v50  ;;  %v1600_v56 = vadd.f32 %v529_v2, %v272_v55  ;;  %v277_v55 = vmul.f32 %v1530_v41, %v53_v21  ;;  %v1126_v21 = vld [vmem:[%s2458_s1 + $0x258] sm:$0xff] }
  0xb3   :  { %2477 = vst [vmem:[#allocation12_spill] sm:$0xff] %v1598_v16 }
  0xb4   :  { %2478 = vst [vmem:[#allocation13_spill] sm:$0xff] %v1600_v56  ;;  %1256 = vset.pattern.permute.xlu2 %v1286_v60 }
  0xb5   :  { %778 = vperm.xlu1 %1255, %v1385_v13   ;;  %v1615_v2 = vpop.permute.xlu1 %238  ;;  %842 = vperm.xlu2 %1256, %v1498_v32   ;;  %v1618_v50 = vpop.permute.xlu0 %233  ;;  %v57_v13 = vld [vmem:[%s2458_s1 + $0x50] sm:$0xff]  ;;  %v58_v32 = vld [vmem:[%s2458_s1 + $0x58] sm:$0xff] }
  0xb6   :  { %2479 = vst [vmem:[#allocation14_spill] sm:$0xff] %v1615_v2  ;;  %766 = vperm.xlu0 %1257, %v1367_v10   ;;  %v414_v54 = vpop.permute.xlu2 %413  ;;  %v1125_v10 = vld [vmem:[%s2458_s1 + $0x250] sm:$0xff] }
  0xb7   :  { %v534_v59 = vmul.f32 %v1121_v18, %v414_v54  ;;  %v535_v60 = vmul.f32 %v1122_v39, %v414_v54  ;;  %v281_v18 = vmul.f32 %v1510_v35, %v57_v13  ;;  %v282_v39 = vmul.f32 %v1510_v35, %v58_v32  ;;  %v1132_v35 = vld [vmem:[%s2458_s1 + $0x288] sm:$0xff] }
  0xb9   :  { %v1623_v61 = vadd.f32 %v534_v59, %v277_v55  ;;  %v1625_v62 = vadd.f32 %v535_v60, %v278_v58 }
  0xbb   :  { %2480 = vst [vmem:[#allocation15_spill] sm:$0xff] %v1623_v61 }
  0xbc   :  { %2481 = vst [vmem:[#allocation16_spill] sm:$0xff] %v1625_v62 }
  0xbd   :  { %774 = vperm.xlu1 %1255, %v1390_v14   ;;  %v1640_v41 = vpop.permute.xlu1 %253  ;;  %838 = vperm.xlu2 %1256, %v1475_v28   ;;  %v1643_v33 = vpop.permute.xlu0 %248  ;;  %v63_v14 = vld [vmem:[%s2458_s1 + $0x80] sm:$0xff]  ;;  %v64_v28 = vld [vmem:[%s2458_s1 + $0x88] sm:$0xff] }
  0xbe   :  { %2482 = vst [vmem:[#allocation17_spill] sm:$0xff] %v1643_v33  ;;  %822 = vperm.xlu0 %1257, %v1462_v26   ;;  %v422_v31 = vpop.permute.xlu2 %421  ;;  %v1131_v26 = vld [vmem:[%s2458_s1 + $0x280] sm:$0xff] }
  0xbf   :  { %v538_v54 = vmul.f32 %v1125_v10, %v422_v31  ;;  %v539_v55 = vmul.f32 %v1126_v21, %v422_v31  ;;  %v287_v10 = vmul.f32 %v1515_v36, %v63_v14  ;;  %v288_v21 = vmul.f32 %v1515_v36, %v64_v28  ;;  %v52_v36 = vld [vmem:[%s2458_s1 + $0x28] sm:$0xff]  ;;  %v1119_v14 = vld [vmem:[%s2458_s1 + $0x220] sm:$0xff] }
  0xc0   :  { %v1120_v28 = vld [vmem:[%s2458_s1 + $0x228] sm:$0xff]  ;;  %v276_v16 = vmul.f32 %v1523_v38, %v52_v36 }
  0xc1   :  { %v1648_v58 = vadd.f32 %v538_v54, %v281_v18  ;;  %v1650_v59 = vadd.f32 %v539_v55, %v282_v39  ;;  %v49_v55 = vld [vmem:[%s2458_s1 + $0x10] sm:$0xff]  ;;  %v56_v36 = vld [vmem:[%s2458_s1 + $0x48] sm:$0xff] }
  0xc3   :  { %2483 = vst [vmem:[#allocation18_spill] sm:$0xff] %v1648_v58 }
  0xc4   :  { %2484 = vst [vmem:[#allocation19_spill] sm:$0xff] %v1650_v59 }
  0xc5   :  { %770 = vperm.xlu1 %1255, %v1395_v15   ;;  %v1665_v60 = vpop.permute.xlu1 %268  ;;  %834 = vperm.xlu2 %1256, %v1480_v29   ;;  %v1668_v13 = vpop.permute.xlu0 %263  ;;  %v69_v15 = vld [vmem:[%s2458_s1 + $0xb0] sm:$0xff]  ;;  %v70_v29 = vld [vmem:[%s2458_s1 + $0xb8] sm:$0xff] }
  0xc6   :  { %750 = vperm.xlu0 %1257, %v1354_v8   ;;  %v434_v32 = vpop.permute.xlu2 %433  ;;  %v51_v8 = vld [vmem:[%s2458_s1 + $0x20] sm:$0xff] }
  0xc7   :  { %v544_v31 = vmul.f32 %v1131_v26, %v434_v32  ;;  %v545_v18 = vmul.f32 %v1132_v35, %v434_v32  ;;  %v1137_v26 = vld [vmem:[%s2458_s1 + $0x2b0] sm:$0xff]  ;;  %v1138_v35 = vld [vmem:[%s2458_s1 + $0x2b8] sm:$0xff]  ;;  %v275_v56 = vmul.f32 %v1523_v38, %v51_v8  ;;  %v55_v8 = vld [vmem:[%s2458_s1 + $0x40] sm:$0xff] }
  0xc8   :  { %v50_v32 = vld [vmem:[%s2458_s1 + $0x18] sm:$0xff] }
  0xc9   :  { %v1673_v39 = vadd.f32 %v544_v31, %v287_v10  ;;  %v1675_v54 = vadd.f32 %v545_v18, %v288_v21  ;;  %v1117_v10 = vld [vmem:[%s2458_s1 + $0x210] sm:$0xff]  ;;  %v1118_v21 = vld [vmem:[%s2458_s1 + $0x218] sm:$0xff]  ;;  %v293_v31 = vmul.f32 %v1520_v37, %v69_v15  ;;  %v294_v18 = vmul.f32 %v1520_v37, %v70_v29 }
  0xca   :  { %v274_v2 = vmul.f32 %v1532_v42, %v50_v32 }
  0xcb   :  { %2485 = vst [vmem:[#allocation20_spill] sm:$0xff] %v1673_v39  ;;  %v273_v39 = vmul.f32 %v1532_v42, %v49_v55  ;;  %v75_v42 = vld [vmem:[%s2458_s1 + $0xe0] sm:$0xff]  ;;  %v1128_v55 = vld [vmem:[%s2458_s1 + $0x268] sm:$0xff] }
  0xcc   :  { %2486 = vst [vmem:[#allocation21_spill] sm:$0xff] %v1675_v54 }
  0xcd   :  { %830 = vperm.xlu1 %1255, %v1485_v30   ;;  %762 = vperm.xlu2 %1256, %v1372_v11  }
  0xce   :  { %810 = vperm.xlu0 %1257, %v1444_v23   ;;  %v410_v30 = vpop.permute.xlu1 %409  ;;  %v446_v11 = vpop.permute.xlu2 %445 }
  0xcf   :  { %v532_v62 = vmul.f32 %v1119_v14, %v410_v30  ;;  %v533_v61 = vmul.f32 %v1120_v28, %v410_v30  ;;  %v550_v59 = vmul.f32 %v1137_v26, %v446_v11  ;;  %v551_v58 = vmul.f32 %v1138_v35, %v446_v11  ;;  %v406_v54 = vpop.permute.xlu0 %405 }
  0xd0   :  { %v530_v15 = vmul.f32 %v1117_v10, %v406_v54  ;;  %v531_v33 = vmul.f32 %v1118_v21, %v406_v54  ;;  %v1127_v54 = vld [vmem:[%s2458_s1 + $0x260] sm:$0xff]  ;;  %v279_v14 = vmul.f32 %v1505_v34, %v55_v8  ;;  %v280_v28 = vmul.f32 %v1505_v34, %v56_v36 }
  0xd1   :  { %v1722_v37 = vadd.f32 %v550_v59, %v293_v31  ;;  %v1724_v29 = vadd.f32 %v551_v58, %v294_v18  ;;  %v1726_v38 = vadd.f32 %v532_v62, %v275_v56  ;;  %v1728_v23 = vadd.f32 %v533_v61, %v276_v16  ;;  %v76_v16 = vld [vmem:[%s2458_s1 + $0xe8] sm:$0xff]  ;;  %v59_v56 = vld [vmem:[%s2458_s1 + $0x60] sm:$0xff] }
  0xd2   :  { %v1739_v59 = vadd.f32 %v530_v15, %v273_v39  ;;  %v1741_v58 = vadd.f32 %v531_v33, %v274_v2  ;;  %v1123_v61 = vld [vmem:[%s2458_s1 + $0x240] sm:$0xff]  ;;  %v1124_v62 = vld [vmem:[%s2458_s1 + $0x248] sm:$0xff]  ;;  %v299_v26 = vmul.f32 %v1527_v40, %v75_v42  ;;  %v300_v35 = vmul.f32 %v1527_v40, %v76_v16  ;;  %v81_v42 = vld [vmem:[%s2458_s1 + $0x110] sm:$0xff] }
  0xd3   :  { %2487 = vst [vmem:[#allocation22_spill] sm:$0xff] %v1726_v38  ;;  %v1143_v2 = vld [vmem:[%s2458_s1 + $0x2e0] sm:$0xff]  ;;  %v1144_v33 = vld [vmem:[%s2458_s1 + $0x2e8] sm:$0xff]  ;;  %v283_v30 = vmul.f32 %v1541_v45, %v59_v56  ;;  %v82_v16 = vld [vmem:[%s2458_s1 + $0x118] sm:$0xff] }
  0xd4   :  { %2488 = vst [vmem:[#allocation23_spill] sm:$0xff] %v1728_v23  ;;  %v60_v39 = vld [vmem:[%s2458_s1 + $0x68] sm:$0xff] }
  0xd5   :  { %2489 = vst [vmem:[#allocation24_spill] sm:$0xff] %v1739_v59  ;;  %826 = vperm.xlu1 %1255, %v1457_v25   ;;  %758 = vperm.xlu2 %1256, %v1377_v12   ;;  %v284_v11 = vmul.f32 %v1541_v45, %v60_v39  ;;  %v61_v45 = vld [vmem:[%s2458_s1 + $0x70] sm:$0xff]  ;;  %v1130_v39 = vld [vmem:[%s2458_s1 + $0x278] sm:$0xff]  ;;  %v2511_v59 = vld [vmem:[#allocation9_spill] sm:$0xff] }
  0xd6   :  { %2490 = vst [vmem:[#allocation25_spill] sm:$0xff] %v1741_v58  ;;  %738 = vperm.xlu0 %1257, %v1313_v0   ;;  %v418_v25 = vpop.permute.xlu1 %417  ;;  %v458_v12 = vpop.permute.xlu2 %457  ;;  %v1173_v58 = vld [vmem:[%s2458_s1 + $0x3d0] sm:$0xff] }
  0xd7   :  { %v536_v32 = vmul.f32 %v1123_v61, %v418_v25  ;;  %v537_v10 = vmul.f32 %v1124_v62, %v418_v25  ;;  %v556_v21 = vmul.f32 %v1143_v2, %v458_v12  ;;  %v557_v31 = vmul.f32 %v1144_v33, %v458_v12  ;;  %v426_v18 = vpop.permute.xlu0 %425  ;;  %v62_v62 = vld [vmem:[%s2458_s1 + $0x78] sm:$0xff]  ;;  %v65_v2 = vld [vmem:[%s2458_s1 + $0x90] sm:$0xff] }
  0xd8   :  { %v540_v15 = vmul.f32 %v1127_v54, %v426_v18  ;;  %v541_v8 = vmul.f32 %v1128_v55, %v426_v18  ;;  %v1129_v33 = vld [vmem:[%s2458_s1 + $0x270] sm:$0xff]  ;;  %v1150_v55 = vld [vmem:[%s2458_s1 + $0x318] sm:$0xff]  ;;  %v306_v25 = vmul.f32 %v1536_v43, %v82_v16  ;;  %v285_v12 = vmul.f32 %v1539_v44, %v61_v45  ;;  %v87_v45 = vld [vmem:[%s2458_s1 + $0x140] sm:$0xff] }
  0xd9   :  { %v1779_v34 = vadd.f32 %v556_v21, %v299_v26  ;;  %v1781_v36 = vadd.f32 %v557_v31, %v300_v35  ;;  %v1783_v40 = vadd.f32 %v536_v32, %v279_v14  ;;  %v1785_v0 = vadd.f32 %v537_v10, %v280_v28  ;;  %v1149_v54 = vld [vmem:[%s2458_s1 + $0x310] sm:$0xff]  ;;  %v66_v14 = vld [vmem:[%s2458_s1 + $0x98] sm:$0xff] }
  0xda   :  { %v1796_v56 = vadd.f32 %v540_v15, %v283_v30  ;;  %v1798_v61 = vadd.f32 %v541_v8, %v284_v11  ;;  %v1133_v28 = vld [vmem:[%s2458_s1 + $0x290] sm:$0xff]  ;;  %v1134_v26 = vld [vmem:[%s2458_s1 + $0x298] sm:$0xff]  ;;  %v305_v35 = vmul.f32 %v1536_v43, %v81_v42  ;;  %v286_v32 = vmul.f32 %v1539_v44, %v62_v62  ;;  %v88_v62 = vld [vmem:[%s2458_s1 + $0x148] sm:$0xff] }
  0xdb   :  { %2491 = vst [vmem:[#allocation26_spill] sm:$0xff] %v1783_v40  ;;  %v289_v11 = vmul.f32 %v1550_v48, %v65_v2  ;;  %v290_v15 = vmul.f32 %v1550_v48, %v66_v14  ;;  %v67_v48 = vld [vmem:[%s2458_s1 + $0xa0] sm:$0xff]  ;;  %v1136_v14 = vld [vmem:[%s2458_s1 + $0x2a8] sm:$0xff] }
  0xdc   :  { %2492 = vst [vmem:[#allocation27_spill] sm:$0xff] %v1785_v0 }
  0xdd   :  { %754 = vperm.xlu1 %1255, %v1349_v7   ;;  %818 = vperm.xlu2 %1256, %v1467_v27  }
  0xde   :  { %798 = vperm.xlu0 %1257, %v1426_v20   ;;  %v430_v7 = vpop.permute.xlu1 %429  ;;  %v470_v27 = vpop.permute.xlu2 %469 }
  0xdf   :  { %v542_v10 = vmul.f32 %v1129_v33, %v430_v7  ;;  %v543_v21 = vmul.f32 %v1130_v39, %v430_v7  ;;  %v562_v31 = vmul.f32 %v1149_v54, %v470_v27  ;;  %v563_v18 = vmul.f32 %v1150_v55, %v470_v27  ;;  %v438_v30 = vpop.permute.xlu0 %437  ;;  %v68_v39 = vld [vmem:[%s2458_s1 + $0xa8] sm:$0xff]  ;;  %v71_v54 = vld [vmem:[%s2458_s1 + $0xc0] sm:$0xff] }
  0xe0   :  { %v546_v8 = vmul.f32 %v1133_v28, %v438_v30  ;;  %v547_v42 = vmul.f32 %v1134_v26, %v438_v30  ;;  %v1135_v55 = vld [vmem:[%s2458_s1 + $0x2a0] sm:$0xff]  ;;  %v1156_v26 = vld [vmem:[%s2458_s1 + $0x348] sm:$0xff]  ;;  %v312_v7 = vmul.f32 %v1545_v46, %v88_v62  ;;  %v291_v27 = vmul.f32 %v1548_v47, %v67_v48 }
  0xe1   :  { %v1836_v43 = vadd.f32 %v542_v10, %v285_v12  ;;  %v1838_v16 = vadd.f32 %v543_v21, %v286_v32  ;;  %v1840_v44 = vadd.f32 %v562_v31, %v305_v35  ;;  %v1842_v20 = vadd.f32 %v563_v18, %v306_v25  ;;  %v1155_v28 = vld [vmem:[%s2458_s1 + $0x340] sm:$0xff]  ;;  %v72_v35 = vld [vmem:[%s2458_s1 + $0xc8] sm:$0xff] }
  0xe2   :  { %v1853_v2 = vadd.f32 %v546_v8, %v289_v11  ;;  %v1855_v33 = vadd.f32 %v547_v42, %v290_v15  ;;  %v1139_v25 = vld [vmem:[%s2458_s1 + $0x2c0] sm:$0xff]  ;;  %v1140_v12 = vld [vmem:[%s2458_s1 + $0x2c8] sm:$0xff]  ;;  %v311_v32 = vmul.f32 %v1545_v46, %v87_v45  ;;  %v292_v10 = vmul.f32 %v1548_v47, %v68_v39 }
  0xe3   :  { %2493 = vst [vmem:[#allocation28_spill] sm:$0xff] %v1840_v44  ;;  %v295_v15 = vmul.f32 %v1559_v51, %v71_v54  ;;  %v296_v8 = vmul.f32 %v1559_v51, %v72_v35  ;;  %v93_v54 = vld [vmem:[%s2458_s1 + $0x170] sm:$0xff]  ;;  %v94_v51 = vld [vmem:[%s2458_s1 + $0x178] sm:$0xff] }
  0xe4   :  { %2494 = vst [vmem:[#allocation29_spill] sm:$0xff] %v1842_v20  ;;  %v317_v35 = vmul.f32 %v1554_v49, %v93_v54 }
  0xe5   :  { %814 = vperm.xlu1 %1255, %v1439_v22   ;;  %746 = vperm.xlu2 %1256, %v1359_v9  }
  0xe6   :  { %726 = vperm.xlu0 %1257, %v1341_v6   ;;  %v442_v22 = vpop.permute.xlu1 %441  ;;  %v482_v9 = vpop.permute.xlu2 %481 }
  0xe7   :  { %v548_v21 = vmul.f32 %v1135_v55, %v442_v22  ;;  %v549_v31 = vmul.f32 %v1136_v14, %v442_v22  ;;  %v568_v18 = vmul.f32 %v1155_v28, %v482_v9  ;;  %v569_v30 = vmul.f32 %v1156_v26, %v482_v9  ;;  %v450_v11 = vpop.permute.xlu0 %449  ;;  %v1161_v55 = vld [vmem:[%s2458_s1 + $0x370] sm:$0xff]  ;;  %v1162_v14 = vld [vmem:[%s2458_s1 + $0x378] sm:$0xff]  ;;  %v83_v22 = vld [vmem:[%s2458_s1 + $0x120] sm:$0xff] }
  0xe8   :  { %v552_v42 = vmul.f32 %v1139_v25, %v450_v11  ;;  %v553_v45 = vmul.f32 %v1140_v12, %v450_v11  ;;  %v318_v25 = vmul.f32 %v1554_v49, %v94_v51  ;;  %v80_v49 = vld [vmem:[%s2458_s1 + $0x108] sm:$0xff]  ;;  %v1147_v9 = vld [vmem:[%s2458_s1 + $0x300] sm:$0xff] }
  0xe9   :  { %v1893_v46 = vadd.f32 %v548_v21, %v291_v27  ;;  %v1895_v62 = vadd.f32 %v549_v31, %v292_v10  ;;  %v1897_v47 = vadd.f32 %v568_v18, %v311_v32  ;;  %v1899_v6 = vadd.f32 %v569_v30, %v312_v7  ;;  %v1148_v21 = vld [vmem:[%s2458_s1 + $0x308] sm:$0xff]  ;;  %v1167_v31 = vld [vmem:[%s2458_s1 + $0x3a0] sm:$0xff] }
  0xea   :  { %v1901_v48 = vadd.f32 %v552_v42, %v295_v15  ;;  %v1903_v39 = vadd.f32 %v553_v45, %v296_v8  ;;  %v1168_v18 = vld [vmem:[%s2458_s1 + $0x3a8] sm:$0xff]  ;;  %v1151_v11 = vld [vmem:[%s2458_s1 + $0x320] sm:$0xff]  ;;  %v304_v54 = vmul.f32 %v1566_v53, %v80_v49 }
  0xeb   :  { %2495 = vst [vmem:[#allocation30_spill] sm:$0xff] %v1897_v47  ;;  %v84_v30 = vld [vmem:[%s2458_s1 + $0x128] sm:$0xff] }
  0xec   :  { %2496 = vst [vmem:[#allocation31_spill] sm:$0xff] %v1899_v6  ;;  %v1152_v15 = vld [vmem:[%s2458_s1 + $0x328] sm:$0xff] }
  0xed   :  { %742 = vperm.xlu1 %1255, %v1331_v4   ;;  %806 = vperm.xlu2 %1256, %v1449_v24   ;;  %v99_v4 = vld [vmem:[%s2458_s1 + $0x1a0] sm:$0xff] }
  0xee   :  { %786 = vperm.xlu0 %1257, %v1408_v17   ;;  %v1920_v28 = vpop.permute.xlu1 %453  ;;  %v494_v26 = vpop.permute.xlu2 %493  ;;  %v100_v17 = vld [vmem:[%s2458_s1 + $0x1a8] sm:$0xff]  ;;  %v79_v24 = vld [vmem:[%s2458_s1 + $0x100] sm:$0xff]  ;;  %v323_v8 = vmul.f32 %v1563_v52, %v99_v4 }
  0xef   :  { %v574_v12 = vmul.f32 %v1161_v55, %v494_v26  ;;  %v575_v32 = vmul.f32 %v1162_v14, %v494_v26  ;;  %v1924_v7 = vpop.permute.xlu0 %461  ;;  %v324_v42 = vmul.f32 %v1563_v52, %v100_v17  ;;  %v303_v45 = vmul.f32 %v1566_v53, %v79_v24 }
  0xf1   :  { %v1926_v27 = vadd.f32 %v574_v12, %v317_v35  ;;  %v1928_v10 = vadd.f32 %v575_v32, %v318_v25  ;;  %v307_v25 = vmul.f32 %v1577_v57, %v83_v22  ;;  %v308_v12 = vmul.f32 %v1577_v57, %v84_v30  ;;  %v85_v22 = vld [vmem:[%s2458_s1 + $0x130] sm:$0xff]  ;;  %v86_v57 = vld [vmem:[%s2458_s1 + $0x138] sm:$0xff] }
  0xf2   :  { %v1157_v30 = vld [vmem:[%s2458_s1 + $0x350] sm:$0xff] }
  0xf5   :  { %802 = vperm.xlu1 %1255, %v1421_v19   ;;  %734 = vperm.xlu2 %1256, %v1336_v5  }
  0xf6   :  { %v466_v51 = vpop.permute.xlu1 %465  ;;  %v506_v19 = vpop.permute.xlu2 %505 }
  0xf7   :  { %v560_v55 = vmul.f32 %v1147_v9, %v466_v51  ;;  %v561_v5 = vmul.f32 %v1148_v21, %v466_v51  ;;  %v580_v14 = vmul.f32 %v1167_v31, %v506_v19  ;;  %v581_v26 = vmul.f32 %v1168_v18, %v506_v19  ;;  %v474_v35 = vpop.permute.xlu0 %473  ;;  %v89_v9 = vld [vmem:[%s2458_s1 + $0x150] sm:$0xff]  ;;  %v90_v31 = vld [vmem:[%s2458_s1 + $0x158] sm:$0xff] }
  0xf8   :  { %v564_v32 = vmul.f32 %v1151_v11, %v474_v35  ;;  %v565_v20 = vmul.f32 %v1152_v15, %v474_v35  ;;  %v1153_v21 = vld [vmem:[%s2458_s1 + $0x330] sm:$0xff]  ;;  %v1158_v11 = vld [vmem:[%s2458_s1 + $0x358] sm:$0xff] }
  0xf9   :  { %v1974_v4 = vadd.f32 %v580_v14, %v323_v8  ;;  %v1976_v52 = vadd.f32 %v581_v26, %v324_v42  ;;  %v1978_v17 = vadd.f32 %v560_v55, %v303_v45  ;;  %v1980_v53 = vadd.f32 %v561_v5, %v304_v54  ;;  %v2501_v18 = vld [vmem:[#allocation7_spill] sm:$0xff] }
  0xfa   :  { %v1982_v24 = vadd.f32 %v564_v32, %v307_v25  ;;  %v1984_v49 = vadd.f32 %v565_v20, %v308_v12  ;;  %v1154_v20 = vld [vmem:[%s2458_s1 + $0x338] sm:$0xff]  ;;  %v2502_v42 = vld [vmem:[#allocation11_spill] sm:$0xff]  ;;  %v313_v55 = vmul.f32 %v1595_v3, %v89_v9  ;;  %v314_v5 = vmul.f32 %v1595_v3, %v90_v31  ;;  %v95_v3 = vld [vmem:[%s2458_s1 + $0x180] sm:$0xff] }
  0xfb   :  { %2497 = vst [vmem:[#allocation32_spill] sm:$0xff] %v1978_v17  ;;  %v309_v45 = vmul.f32 %v2502_v42, %v85_v22  ;;  %v310_v54 = vmul.f32 %v2502_v42, %v86_v57  ;;  %v91_v22 = vld [vmem:[%s2458_s1 + $0x160] sm:$0xff]  ;;  %v92_v57 = vld [vmem:[%s2458_s1 + $0x168] sm:$0xff] }
  0xfc   :  { %2498 = vst [vmem:[#allocation33_spill] sm:$0xff] %v1980_v53  ;;  %v1159_v9 = vld [vmem:[%s2458_s1 + $0x360] sm:$0xff]  ;;  %v2507_v31 = vld [vmem:[#allocation6_spill] sm:$0xff] }
  0xfd   :  { %2499 = vst [vmem:[#allocation34_spill] sm:$0xff] %v1982_v24  ;;  %730 = vperm.xlu1 %1255, %v1318_v1   ;;  %794 = vperm.xlu2 %1256, %v2501_v18   ;;  %v2508_v18 = vld [vmem:[#allocation5_spill] sm:$0xff]  ;;  %v110_v24 = vld [vmem:[%s2458_s1 + $0x1f8] sm:$0xff] }
  0xfe   :  { %2500 = vst [vmem:[#allocation35_spill] sm:$0xff] %v1984_v49  ;;  %v478_v15 = vpop.permute.xlu1 %477  ;;  %v2012_v8 = vpop.permute.xlu2 %521  ;;  %v109_v49 = vld [vmem:[%s2458_s1 + $0x1f0] sm:$0xff] }
  0xff   :  { %v566_v51 = vmul.f32 %v1153_v21, %v478_v15  ;;  %v567_v19 = vmul.f32 %v1154_v20, %v478_v15  ;;  %v486_v1 = vpop.permute.xlu0 %485  ;;  %v1160_v21 = vld [vmem:[%s2458_s1 + $0x368] sm:$0xff] }
 0x100   :  { %v570_v14 = vmul.f32 %v1157_v30, %v486_v1  ;;  %v571_v26 = vmul.f32 %v1158_v11, %v486_v1  ;;  %v96_v20 = vld [vmem:[%s2458_s1 + $0x188] sm:$0xff]  ;;  %v1163_v30 = vld [vmem:[%s2458_s1 + $0x380] sm:$0xff] }
 0x101   :  { %v2018_v35 = vadd.f32 %v566_v51, %v309_v45  ;;  %v2020_v25 = vadd.f32 %v567_v19, %v310_v54  ;;  %v1164_v11 = vld [vmem:[%s2458_s1 + $0x388] sm:$0xff]  ;;  %v315_v45 = vmul.f32 %v1593_v63, %v91_v22  ;;  %v316_v54 = vmul.f32 %v1593_v63, %v92_v57 }
 0x102   :  { %v2022_v12 = vadd.f32 %v570_v14, %v313_v55  ;;  %v2024_v32 = vadd.f32 %v571_v26, %v314_v5  ;;  %v319_v55 = vmul.f32 %v1618_v50, %v95_v3  ;;  %v320_v5 = vmul.f32 %v1618_v50, %v96_v20  ;;  %v77_v3 = vld [vmem:[%s2458_s1 + $0xf0] sm:$0xff]  ;;  %v78_v50 = vld [vmem:[%s2458_s1 + $0xf8] sm:$0xff] }
 0x103   :  { %2503 = vst [vmem:[#allocation7_spill] sm:$0xff] %v2018_v35  ;;  %v1145_v20 = vld [vmem:[%s2458_s1 + $0x2f0] sm:$0xff]  ;;  %v301_v23 = vmul.f32 %v2511_v59, %v77_v3  ;;  %v302_v38 = vmul.f32 %v2511_v59, %v78_v50  ;;  %v1239_v59 = vld [vmem:[%s2458_s1 + $0x5e0] sm:$0xff]  ;;  %v1240_v3 = vld [vmem:[%s2458_s1 + $0x5e8] sm:$0xff] }
 0x104   :  { %2504 = vst [vmem:[#allocation11_spill] sm:$0xff] %v2020_v25 }
 0x105   :  { %2505 = vst [vmem:[#allocation36_spill] sm:$0xff] %v2022_v12  ;;  %790 = vperm.xlu1 %1255, %v2507_v31   ;;  %722 = vperm.xlu2 %1256, %v2508_v18   ;;  %v1172_v12 = vld [vmem:[%s2458_s1 + $0x3c8] sm:$0xff] }
 0x106   :  { %2506 = vst [vmem:[#allocation37_spill] sm:$0xff] %v2024_v32  ;;  %v490_v15 = vpop.permute.xlu1 %489  ;;  %v2052_v42 = vpop.permute.xlu2 %517 }
 0x107   :  { %v572_v51 = vmul.f32 %v1159_v9, %v490_v15  ;;  %v573_v19 = vmul.f32 %v1160_v21, %v490_v15  ;;  %v498_v1 = vpop.permute.xlu0 %497  ;;  %v105_v21 = vld [vmem:[%s2458_s1 + $0x1d0] sm:$0xff] }
 0x108   :  { %v576_v14 = vmul.f32 %v1163_v30, %v498_v1  ;;  %v577_v26 = vmul.f32 %v1164_v11, %v498_v1  ;;  %v1146_v30 = vld [vmem:[%s2458_s1 + $0x2f8] sm:$0xff]  ;;  %v1177_v1 = vld [vmem:[%s2458_s1 + $0x3f0] sm:$0xff] }
 0x109   :  { %v2058_v31 = vadd.f32 %v572_v51, %v315_v45  ;;  %v2060_v18 = vadd.f32 %v573_v19, %v316_v54  ;;  %v106_v45 = vld [vmem:[%s2458_s1 + $0x1d8] sm:$0xff]  ;;  %v1175_v54 = vld [vmem:[%s2458_s1 + $0x3e0] sm:$0xff]  ;;  %v1176_v51 = vld [vmem:[%s2458_s1 + $0x3e8] sm:$0xff]  ;;  %v559_v44 = vmul.f32 %v1146_v30, %v1924_v7 }
 0x10a   :  { %v2062_v53 = vadd.f32 %v576_v14, %v319_v55  ;;  %v2064_v17 = vadd.f32 %v577_v26, %v320_v5  ;;  %v103_v19 = vld [vmem:[%s2458_s1 + $0x1c0] sm:$0xff]  ;;  %v1178_v55 = vld [vmem:[%s2458_s1 + $0x3f8] sm:$0xff]  ;;  %v108_v14 = vld [vmem:[%s2458_s1 + $0x1e8] sm:$0xff]  ;;  %v558_v26 = vmul.f32 %v1145_v20, %v1924_v7  ;;  %v588_v20 = vmul.f32 %v1175_v54, %v2012_v8 }
 0x10b   :  { %2509 = vst [vmem:[#allocation6_spill] sm:$0xff] %v2058_v31  ;;  %v107_v5 = vld [vmem:[%s2458_s1 + $0x1e0] sm:$0xff]  ;;  %v589_v7 = vmul.f32 %v1176_v51, %v2012_v8  ;;  %v2512_v30 = vld [vmem:[#allocation10_spill] sm:$0xff]  ;;  %v327_v47 = vmul.f32 %v1640_v41, %v103_v19  ;;  %v332_v8 = vmul.f32 %v1668_v13, %v108_v14  ;;  %v1242_v51 = vld [vmem:[%s2458_s1 + $0x5f8] sm:$0xff] }
 0x10c   :  { %2510 = vst [vmem:[#allocation5_spill] sm:$0xff] %v2060_v18  ;;  %v329_v25 = vmul.f32 %v2512_v30, %v105_v21  ;;  %v330_v35 = vmul.f32 %v2512_v30, %v106_v45  ;;  %v331_v54 = vmul.f32 %v1668_v13, %v107_v5  ;;  %v586_v21 = vmul.f32 %v1173_v58, %v2052_v42  ;;  %v1241_v45 = vld [vmem:[%s2458_s1 + $0x5f0] sm:$0xff]  ;;  %v1174_v19 = vld [vmem:[%s2458_s1 + $0x3d8] sm:$0xff]  ;;  %v104_v18 = vld [vmem:[%s2458_s1 + $0x1c8] sm:$0xff] }
 0x10d   :  { %v333_v30 = vmul.f32 %v1665_v60, %v109_v49  ;;  %v1209_v13 = vld [vmem:[%s2458_s1 + $0x4f0] sm:$0xff]  ;;  %v1210_v58 = vld [vmem:[%s2458_s1 + $0x4f8] sm:$0xff]  ;;  %v653_v32 = vadd.f32 %v589_v7, %v332_v8 }
 0x10e   :  { %v2066_v22 = vpop.permute.xlu1 %501  ;;  %v652_v40 = vadd.f32 %v588_v20, %v331_v54  ;;  %v1235_v20 = vld [vmem:[%s2458_s1 + $0x5c0] sm:$0xff]  ;;  %v650_v8 = vadd.f32 %v586_v21, %v329_v25 }
 0x10f   :  { %v2068_v63 = vpop.permute.xlu0 %509  ;;  %v843_v57 = vpop.permute.xlu2 %842 }
 0x110   :  { %v909_v5 = vmul.f32 %v1239_v59, %v843_v57  ;;  %v910_v14 = vmul.f32 %v1240_v3, %v843_v57  ;;  %v587_v3 = vmul.f32 %v1174_v19, %v2052_v42 }
 0x112   :  { %v973_v19 = vadd.f32 %v909_v5, %v652_v40  ;;  %v1141_v5 = vld [vmem:[%s2458_s1 + $0x2d0] sm:$0xff] }
 0x116   :  { %v526_v9 = vpop.permute.xlu1 %525 }
 0x117   :  { %v2085_v11 = vpop.permute.xlu0 %513  ;;  %v2087_v15 = vpop.permute.xlu2 %838  ;;  %v590_v50 = vmul.f32 %v1177_v1, %v526_v9  ;;  %v591_v6 = vmul.f32 %v1178_v55, %v526_v9  ;;  %v334_v9 = vmul.f32 %v1665_v60, %v110_v24  ;;  %v622_v1 = vadd.f32 %v558_v26, %v301_v23  ;;  %v1171_v60 = vld [vmem:[%s2458_s1 + $0x3c0] sm:$0xff]  ;;  %v1237_v24 = vld [vmem:[%s2458_s1 + $0x5d0] sm:$0xff] }
 0x118   :  { %v623_v55 = vadd.f32 %v559_v44, %v302_v38  ;;  %v1238_v38 = vld [vmem:[%s2458_s1 + $0x5d8] sm:$0xff]  ;;  %v584_v31 = vmul.f32 %v1171_v60, %v2085_v11 }
 0x119   :  { %v654_v26 = vadd.f32 %v590_v50, %v333_v30  ;;  %v655_v59 = vadd.f32 %v591_v6, %v334_v9  ;;  %v1236_v6 = vld [vmem:[%s2458_s1 + $0x5c8] sm:$0xff]  ;;  %v908_v30 = vmul.f32 %v1238_v38, %v2087_v15  ;;  %v73_v38 = vld [vmem:[%s2458_s1 + $0xd0] sm:$0xff] }
 0x11f   :  { %v847_v49 = vpop.permute.xlu1 %846  ;;  %v835_v0 = vpop.permute.xlu2 %834 }
 0x120   :  { %v911_v23 = vmul.f32 %v1241_v45, %v847_v49  ;;  %v912_v44 = vmul.f32 %v1242_v51, %v847_v49  ;;  %v783_v57 = vpop.permute.xlu0 %782  ;;  %v907_v45 = vmul.f32 %v1237_v24, %v2087_v15  ;;  %v585_v51 = vmul.f32 %v1172_v12, %v2085_v11  ;;  %v1207_v24 = vld [vmem:[%s2458_s1 + $0x4e0] sm:$0xff]  ;;  %v1208_v12 = vld [vmem:[%s2458_s1 + $0x4e8] sm:$0xff] }
 0x121   :  { %v879_v7 = vmul.f32 %v1209_v13, %v783_v57  ;;  %v880_v54 = vmul.f32 %v1210_v58, %v783_v57  ;;  %v905_v21 = vmul.f32 %v1235_v20, %v835_v0  ;;  %v974_v13 = vadd.f32 %v910_v14, %v653_v32  ;;  %v1142_v14 = vld [vmem:[%s2458_s1 + $0x2d8] sm:$0xff] }
 0x122   :  { %v975_v42 = vadd.f32 %v911_v23, %v654_v26  ;;  %v976_v50 = vadd.f32 %v912_v44, %v655_v59  ;;  %v328_v58 = vmul.f32 %v1640_v41, %v104_v18  ;;  %v906_v60 = vmul.f32 %v1236_v6, %v835_v0  ;;  %v74_v23 = vld [vmem:[%s2458_s1 + $0xd8] sm:$0xff] }
 0x123   :  { %v943_v9 = vadd.f32 %v879_v7, %v622_v1  ;;  %v944_v25 = vadd.f32 %v880_v54, %v623_v55  ;;  %v651_v11 = vadd.f32 %v587_v3, %v330_v35  ;;  %v971_v15 = vadd.f32 %v907_v45, %v650_v8  ;;  %v2513_v26 = vld [vmem:[#allocation8_spill] sm:$0xff] }
 0x124   :  { %1004 = vmatpush.msra.mxu1 %v975_v42  ;;  %1050 = vmatpush.msra.mxu3 %v976_v50  ;;  %v648_v1 = vadd.f32 %v584_v31, %v327_v47  ;;  %v649_v55 = vadd.f32 %v585_v51, %v328_v58  ;;  %v554_v44 = vmul.f32 %v1141_v5, %v1920_v28  ;;  %v1201_v51 = vld [vmem:[%s2458_s1 + $0x4b0] sm:$0xff]  ;;  %v1170_v58 = vld [vmem:[%s2458_s1 + $0x3b8] sm:$0xff] }
 0x125   :  { %981 = vmatpush.msra.mxu0 %v943_v9  ;;  %1027 = vmatpush.msra.mxu2 %v944_v25  ;;  %v972_v32 = vadd.f32 %v908_v30, %v651_v11  ;;  %v555_v57 = vmul.f32 %v1142_v14, %v1920_v28  ;;  %v297_v59 = vmul.f32 %v2513_v26, %v73_v38  ;;  %v1202_v30 = vld [vmem:[%s2458_s1 + $0x4b8] sm:$0xff]  ;;  %v1203_v9 = vld [vmem:[%s2458_s1 + $0x4c0] sm:$0xff]  ;;  %v1204_v25 = vld [vmem:[%s2458_s1 + $0x4c8] sm:$0xff] }
 0x126   :  { %1005 = vmatpush.msra.mxu1 %v973_v19  ;;  %1051 = vmatpush.msra.mxu3 %v974_v13  ;;  %v969_v18 = vadd.f32 %v905_v21, %v648_v1  ;;  %v970_v49 = vadd.f32 %v906_v60, %v649_v55  ;;  %v298_v3 = vmul.f32 %v2513_v26, %v74_v23  ;;  %v1199_v21 = vld [vmem:[%s2458_s1 + $0x4a0] sm:$0xff]  ;;  %v1169_v13 = vld [vmem:[%s2458_s1 + $0x3b0] sm:$0xff]  ;;  %v1200_v60 = vld [vmem:[%s2458_s1 + $0x4a8] sm:$0xff] }
 0x127   :  { %v779_v40 = vpop.permute.xlu1 %778  ;;  %v763_v35 = vpop.permute.xlu2 %762  ;;  %v618_v45 = vadd.f32 %v554_v44, %v297_v59  ;;  %v102_v5 = vld [vmem:[%s2458_s1 + $0x1b8] sm:$0xff]  ;;  %v582_v14 = vmul.f32 %v1169_v13, %v2068_v63  ;;  %v2514_v44 = vld [vmem:[#allocation17_spill] sm:$0xff] }
 0x128   :  { %v877_v41 = vmul.f32 %v1207_v24, %v779_v40  ;;  %v878_v0 = vmul.f32 %v1208_v12, %v779_v40  ;;  %1006 = vmatpush.msra.mxu1 %v971_v15  ;;  %1052 = vmatpush.msra.mxu3 %v972_v32  ;;  %v767_v20 = vpop.permute.xlu0 %766  ;;  %v619_v28 = vadd.f32 %v555_v57, %v298_v3  ;;  %v1197_v40 = vld [vmem:[%s2458_s1 + $0x490] sm:$0xff]  ;;  %v1227_v13 = vld [vmem:[%s2458_s1 + $0x580] sm:$0xff] }
 0x129   :  { %v871_v24 = vmul.f32 %v1201_v51, %v767_v20  ;;  %v872_v12 = vmul.f32 %v1202_v30, %v767_v20  ;;  %v101_v32 = vld [vmem:[%s2458_s1 + $0x1b0] sm:$0xff]  ;;  %v869_v55 = vmul.f32 %v1199_v21, %v763_v35  ;;  %v1231_v51 = vld [vmem:[%s2458_s1 + $0x5a0] sm:$0xff]  ;;  %v1232_v30 = vld [vmem:[%s2458_s1 + $0x5a8] sm:$0xff] }
 0x12a   :  { %1007 = vmatpush.msra.mxu1 %v969_v18  ;;  %v941_v47 = vadd.f32 %v877_v41, %v1779_v34  ;;  %v942_v31 = vadd.f32 %v878_v0, %v1781_v36  ;;  %1053 = vmatpush.msra.mxu3 %v970_v49  ;;  %v1205_v34 = vld [vmem:[%s2458_s1 + $0x4d0] sm:$0xff]  ;;  %v1206_v36 = vld [vmem:[%s2458_s1 + $0x4d8] sm:$0xff]  ;;  %v583_v49 = vmul.f32 %v1170_v58, %v2068_v63 }
 0x12b   :  { %v1198_v41 = vld [vmem:[%s2458_s1 + $0x498] sm:$0xff]  ;;  %v935_v38 = vadd.f32 %v871_v24, %v1722_v37  ;;  %v936_v23 = vadd.f32 %v872_v12, %v1724_v29  ;;  %v933_v37 = vadd.f32 %v869_v55, %v1893_v46 }
 0x12c   :  { %982 = vmatpush.msra.mxu0 %v941_v47  ;;  %1028 = vmatpush.msra.mxu2 %v942_v31  ;;  %v870_v47 = vmul.f32 %v1200_v60, %v763_v35  ;;  %v1234_v63 = vld [vmem:[%s2458_s1 + $0x5b8] sm:$0xff]  ;;  %v326_v35 = vmul.f32 %v2514_v44, %v102_v5  ;;  %v1193_v5 = vld [vmem:[%s2458_s1 + $0x470] sm:$0xff] }
 0x12e   :  { %v934_v29 = vadd.f32 %v870_v47, %v1895_v62  ;;  %v1166_v62 = vld [vmem:[%s2458_s1 + $0x398] sm:$0xff] }
 0x12f   :  { %v775_v7 = vpop.permute.xlu1 %774  ;;  %v759_v50 = vpop.permute.xlu2 %758  ;;  %v1194_v47 = vld [vmem:[%s2458_s1 + $0x478] sm:$0xff] }
 0x130   :  { %v875_v54 = vmul.f32 %v1205_v34, %v775_v7  ;;  %v876_v8 = vmul.f32 %v1206_v36, %v775_v7  ;;  %v823_v11 = vpop.permute.xlu0 %822  ;;  %v867_v31 = vmul.f32 %v1197_v40, %v759_v50  ;;  %v868_v57 = vmul.f32 %v1198_v41, %v759_v50  ;;  %v1233_v34 = vld [vmem:[%s2458_s1 + $0x5b0] sm:$0xff]  ;;  %v1230_v50 = vld [vmem:[%s2458_s1 + $0x598] sm:$0xff] }
 0x131   :  { %v647_v7 = vadd.f32 %v583_v49, %v326_v35  ;;  %v900_v12 = vmul.f32 %v1230_v50, %v823_v11 }
 0x132   :  { %v939_v6 = vadd.f32 %v875_v54, %v618_v45  ;;  %v940_v42 = vadd.f32 %v876_v8, %v619_v28  ;;  %v931_v20 = vadd.f32 %v867_v31, %v1853_v2  ;;  %v932_v54 = vadd.f32 %v868_v57, %v1855_v33  ;;  %v1165_v8 = vld [vmem:[%s2458_s1 + $0x390] sm:$0xff]  ;;  %v98_v33 = vld [vmem:[%s2458_s1 + $0x198] sm:$0xff] }
 0x133   :  { %v97_v2 = vld [vmem:[%s2458_s1 + $0x190] sm:$0xff] }
 0x134   :  { %983 = vmatpush.msra.mxu0 %v939_v6  ;;  %1029 = vmatpush.msra.mxu2 %v940_v42  ;;  %v1229_v6 = vld [vmem:[%s2458_s1 + $0x590] sm:$0xff]  ;;  %v578_v42 = vmul.f32 %v1165_v8, %v2066_v22  ;;  %v1226_v8 = vld [vmem:[%s2458_s1 + $0x578] sm:$0xff] }
 0x135   :  { %v899_v24 = vmul.f32 %v1229_v6, %v823_v11 }
 0x137   :  { %v771_v19 = vpop.permute.xlu1 %770 }
 0x138   :  { %v873_v15 = vmul.f32 %v1203_v9, %v771_v19  ;;  %v874_v1 = vmul.f32 %v1204_v25, %v771_v19  ;;  %v751_v45 = vpop.permute.xlu0 %750  ;;  %v579_v9 = vmul.f32 %v1166_v62, %v2066_v22  ;;  %v2515_v25 = vld [vmem:[#allocation14_spill] sm:$0xff] }
 0x139   :  { %v321_v21 = vmul.f32 %v2515_v25, %v97_v2  ;;  %v322_v19 = vmul.f32 %v2515_v25, %v98_v33  ;;  %v864_v57 = vmul.f32 %v1194_v47, %v751_v45  ;;  %v1222_v33 = vld [vmem:[%s2458_s1 + $0x558] sm:$0xff]  ;;  %v2518_v25 = vld [vmem:[#allocation6_spill] sm:$0xff]  ;;  %v2523_v47 = vld [vmem:[#allocation19_spill] sm:$0xff] }
 0x13a   :  { %v937_v0 = vadd.f32 %v873_v15, %v1901_v48  ;;  %v938_v18 = vadd.f32 %v874_v1, %v1903_v39  ;;  %v325_v48 = vmul.f32 %v2514_v44, %v101_v32  ;;  %v819_v39 = vpop.permute.xlu2 %818  ;;  %v1228_v15 = vld [vmem:[%s2458_s1 + $0x588] sm:$0xff] }
 0x13b   :  { %v642_v32 = vadd.f32 %v578_v42, %v321_v21  ;;  %v897_v22 = vmul.f32 %v1227_v13, %v819_v39 }
 0x13c   :  { %984 = vmatpush.msra.mxu0 %v937_v0  ;;  %1030 = vmatpush.msra.mxu2 %v938_v18  ;;  %v646_v26 = vadd.f32 %v582_v14, %v325_v48  ;;  %v643_v0 = vadd.f32 %v579_v9, %v322_v19  ;;  %v898_v18 = vmul.f32 %v1228_v15, %v819_v39  ;;  %v1192_v39 = vld [vmem:[%s2458_s1 + $0x468] sm:$0xff]  ;;  %v2519_v19 = vld [vmem:[#allocation5_spill] sm:$0xff]  ;;  %v1186_v15 = vld [vmem:[%s2458_s1 + $0x438] sm:$0xff] }
 0x13d   :  { %v963_v11 = vadd.f32 %v899_v24, %v642_v32  ;;  %v961_v31 = vadd.f32 %v897_v22, %v2062_v53  ;;  %v863_v48 = vmul.f32 %v1193_v5, %v751_v45  ;;  %v2516_v53 = vld [vmem:[#allocation20_spill] sm:$0xff] }
 0x13e   :  { %985 = vmatpush.msra.mxu0 %v935_v38  ;;  %1031 = vmatpush.msra.mxu2 %v936_v23  ;;  %v964_v49 = vadd.f32 %v900_v12, %v643_v0  ;;  %v1191_v38 = vld [vmem:[%s2458_s1 + $0x460] sm:$0xff]  ;;  %v962_v44 = vadd.f32 %v898_v18, %v2064_v17  ;;  %v1185_v12 = vld [vmem:[%s2458_s1 + $0x430] sm:$0xff] }
 0x13f   :  { %v831_v36 = vpop.permute.xlu1 %830  ;;  %v1223_v17 = vld [vmem:[%s2458_s1 + $0x560] sm:$0xff] }
 0x140   :  { %v903_v59 = vmul.f32 %v1233_v34, %v831_v36  ;;  %v904_v3 = vmul.f32 %v1234_v63, %v831_v36  ;;  %986 = vmatpush.msra.mxu0 %v933_v37  ;;  %1032 = vmatpush.msra.mxu2 %v934_v29  ;;  %v811_v14 = vpop.permute.xlu0 %810  ;;  %v2517_v29 = vld [vmem:[#allocation21_spill] sm:$0xff] }
 0x141   :  { %v893_v62 = vmul.f32 %v1223_v17, %v811_v14 }
 0x142   :  { %987 = vmatpush.msra.mxu0 %v931_v20  ;;  %v967_v46 = vadd.f32 %v903_v59, %v646_v26  ;;  %v968_v28 = vadd.f32 %v904_v3, %v647_v7  ;;  %1033 = vmatpush.msra.mxu2 %v932_v54  ;;  %v747_v58 = vpop.permute.xlu2 %746  ;;  %v927_v3 = vadd.f32 %v863_v48, %v1836_v43  ;;  %v1224_v7 = vld [vmem:[%s2458_s1 + $0x568] sm:$0xff]  ;;  %v1225_v54 = vld [vmem:[%s2458_s1 + $0x570] sm:$0xff]  ;;  %v1218_v48 = vld [vmem:[%s2458_s1 + $0x538] sm:$0xff] }
 0x143   :  { %v861_v37 = vmul.f32 %v1191_v38, %v747_v58  ;;  %v862_v59 = vmul.f32 %v1192_v39, %v747_v58  ;;  %v928_v20 = vadd.f32 %v864_v57, %v1838_v16  ;;  %v1221_v43 = vld [vmem:[%s2458_s1 + $0x550] sm:$0xff]  ;;  %v894_v2 = vmul.f32 %v1224_v7, %v811_v14  ;;  %v1188_v58 = vld [vmem:[%s2458_s1 + $0x448] sm:$0xff]  ;;  %v1219_v39 = vld [vmem:[%s2458_s1 + $0x540] sm:$0xff] }
 0x144   :  { %1008 = vmatpush.msra.mxu1 %v967_v46  ;;  %1054 = vmatpush.msra.mxu3 %v968_v28  ;;  %v957_v21 = vadd.f32 %v893_v62, %v2518_v25  ;;  %v2530_v62 = vld [vmem:[#allocation7_spill] sm:$0xff] }
 0x145   :  { %v925_v46 = vadd.f32 %v861_v37, %v1796_v56  ;;  %v926_v28 = vadd.f32 %v862_v59, %v1798_v61  ;;  %v1187_v61 = vld [vmem:[%s2458_s1 + $0x440] sm:$0xff]  ;;  %v958_v13 = vadd.f32 %v894_v2, %v2519_v19  ;;  %v2527_v37 = vld [vmem:[#allocation16_spill] sm:$0xff]  ;;  %v1180_v19 = vld [vmem:[%s2458_s1 + $0x408] sm:$0xff] }
 0x147   :  { %v827_v60 = vpop.permute.xlu1 %826 }
 0x148   :  { %v901_v1 = vmul.f32 %v1231_v51, %v827_v60  ;;  %v902_v40 = vmul.f32 %v1232_v30, %v827_v60  ;;  %v739_v45 = vpop.permute.xlu0 %738  ;;  %v2520_v60 = vld [vmem:[#allocation36_spill] sm:$0xff] }
 0x149   :  { %v857_v22 = vmul.f32 %v1187_v61, %v739_v45 }
 0x14a   :  { %v965_v55 = vadd.f32 %v901_v1, %v1974_v4  ;;  %v966_v41 = vadd.f32 %v902_v40, %v1976_v52  ;;  %v1195_v4 = vld [vmem:[%s2458_s1 + $0x480] sm:$0xff]  ;;  %v1196_v52 = vld [vmem:[%s2458_s1 + $0x488] sm:$0xff]  ;;  %v807_v35 = vpop.permute.xlu2 %806 }
 0x14b   :  { %v891_v50 = vmul.f32 %v1221_v43, %v807_v35  ;;  %v892_v30 = vmul.f32 %v1222_v33, %v807_v35  ;;  %v2521_v40 = vld [vmem:[#allocation37_spill] sm:$0xff]  ;;  %v2529_v43 = vld [vmem:[#allocation31_spill] sm:$0xff] }
 0x14c   :  { %1009 = vmatpush.msra.mxu1 %v965_v55  ;;  %1055 = vmatpush.msra.mxu3 %v966_v41  ;;  %v858_v55 = vmul.f32 %v1188_v58, %v739_v45  ;;  %v2528_v45 = vld [vmem:[#allocation30_spill] sm:$0xff]  ;;  %v2531_v33 = vld [vmem:[#allocation11_spill] sm:$0xff] }
 0x14d   :  { %v955_v24 = vadd.f32 %v891_v50, %v2520_v60  ;;  %v956_v32 = vadd.f32 %v892_v30, %v2521_v40  ;;  %v1183_v50 = vld [vmem:[%s2458_s1 + $0x420] sm:$0xff]  ;;  %v2535_v40 = vld [vmem:[#allocation23_spill] sm:$0xff] }
 0x14e   :  { %1010 = vmatpush.msra.mxu1 %v963_v11  ;;  %1056 = vmatpush.msra.mxu3 %v964_v49  ;;  %v2522_v11 = vld [vmem:[#allocation18_spill] sm:$0xff] }
 0x14f   :  { %v755_v23 = vpop.permute.xlu1 %754 }
 0x150   :  { %v865_v34 = vmul.f32 %v1195_v4, %v755_v23  ;;  %v866_v63 = vmul.f32 %v1196_v52, %v755_v23  ;;  %1011 = vmatpush.msra.mxu1 %v961_v31  ;;  %1057 = vmatpush.msra.mxu3 %v962_v44  ;;  %v799_v41 = vpop.permute.xlu0 %798  ;;  %v1217_v52 = vld [vmem:[%s2458_s1 + $0x530] sm:$0xff]  ;;  %v2524_v31 = vld [vmem:[#allocation26_spill] sm:$0xff] }
 0x151   :  { %v921_v38 = vadd.f32 %v857_v22, %v2524_v31  ;;  %v2525_v23 = vld [vmem:[#allocation27_spill] sm:$0xff]  ;;  %v888_v17 = vmul.f32 %v1218_v48, %v799_v41  ;;  %v1211_v22 = vld [vmem:[%s2458_s1 + $0x500] sm:$0xff] }
 0x152   :  { %v929_v36 = vadd.f32 %v865_v34, %v2516_v53  ;;  %v930_v26 = vadd.f32 %v866_v63, %v2517_v29  ;;  %v735_v9 = vpop.permute.xlu2 %734  ;;  %v922_v44 = vadd.f32 %v858_v55, %v2525_v23  ;;  %v1220_v34 = vld [vmem:[%s2458_s1 + $0x548] sm:$0xff]  ;;  %v2526_v63 = vld [vmem:[#allocation15_spill] sm:$0xff]  ;;  %v1215_v29 = vld [vmem:[%s2458_s1 + $0x520] sm:$0xff] }
 0x153   :  { %v855_v5 = vmul.f32 %v1185_v12, %v735_v9  ;;  %v856_v14 = vmul.f32 %v1186_v15, %v735_v9  ;;  %v2533_v9 = vld [vmem:[#allocation35_spill] sm:$0xff]  ;;  %v2534_v15 = vld [vmem:[#allocation22_spill] sm:$0xff] }
 0x154   :  { %988 = vmatpush.msra.mxu0 %v929_v36  ;;  %1034 = vmatpush.msra.mxu2 %v930_v26  ;;  %v887_v36 = vmul.f32 %v1217_v52, %v799_v41  ;;  %v1216_v26 = vld [vmem:[%s2458_s1 + $0x528] sm:$0xff]  ;;  %v2536_v41 = vld [vmem:[#allocation24_spill] sm:$0xff]  ;;  %v2539_v52 = vld [vmem:[#allocation13_spill] sm:$0xff] }
 0x155   :  { %v919_v35 = vadd.f32 %v855_v5, %v2526_v63  ;;  %v920_v53 = vadd.f32 %v856_v14, %v2527_v37  ;;  %v1212_v14 = vld [vmem:[%s2458_s1 + $0x508] sm:$0xff] }
 0x156   :  { %989 = vmatpush.msra.mxu0 %v927_v3  ;;  %1035 = vmatpush.msra.mxu2 %v928_v20  ;;  %v951_v2 = vadd.f32 %v887_v36, %v2530_v62 }
 0x157   :  { %v815_v16 = vpop.permute.xlu1 %814 }
 0x158   :  { %v895_v6 = vmul.f32 %v1225_v54, %v815_v16  ;;  %v896_v42 = vmul.f32 %v1226_v8, %v815_v16  ;;  %990 = vmatpush.msra.mxu0 %v925_v46  ;;  %1036 = vmatpush.msra.mxu2 %v926_v28  ;;  %v727_v8 = vpop.permute.xlu0 %726  ;;  %v1181_v28 = vld [vmem:[%s2458_s1 + $0x410] sm:$0xff] }
 0x159   :  { %v851_v25 = vmul.f32 %v1181_v28, %v727_v8 }
 0x15a   :  { %v959_v56 = vadd.f32 %v895_v6, %v1926_v27  ;;  %v960_v51 = vadd.f32 %v896_v42, %v1928_v10  ;;  %v1189_v27 = vld [vmem:[%s2458_s1 + $0x450] sm:$0xff]  ;;  %v1190_v10 = vld [vmem:[%s2458_s1 + $0x458] sm:$0xff]  ;;  %v795_v57 = vpop.permute.xlu2 %794  ;;  %v952_v6 = vadd.f32 %v888_v17, %v2531_v33 }
 0x15b   :  { %v885_v7 = vmul.f32 %v1215_v29, %v795_v57  ;;  %v886_v54 = vmul.f32 %v1216_v26, %v795_v57  ;;  %v1182_v42 = vld [vmem:[%s2458_s1 + $0x418] sm:$0xff]  ;;  %v2543_v29 = vld [vmem:[#allocation33_spill] sm:$0xff]  ;;  %v979_v17 = vld [vmem:[%s2457_s0 + $0x10] sm:$0xff] }
 0x15c   :  { %1012 = vmatpush.msra.mxu1 %v959_v56  ;;  %1058 = vmatpush.msra.mxu3 %v960_v51  ;;  %v1184_v56 = vld [vmem:[%s2458_s1 + $0x428] sm:$0xff] }
 0x15d   :  { %v2532_v51 = vld [vmem:[#allocation34_spill] sm:$0xff]  ;;  %v950_v61 = vadd.f32 %v886_v54, %v2533_v9 }
 0x15e   :  { %1013 = vmatpush.msra.mxu1 %v957_v21  ;;  %1059 = vmatpush.msra.mxu3 %v958_v13  ;;  %v949_v30 = vadd.f32 %v885_v7, %v2532_v51  ;;  %v1179_v21 = vld [vmem:[%s2458_s1 + $0x400] sm:$0xff] }
 0x15f   :  { %v743_v1 = vpop.permute.xlu1 %742 }
 0x160   :  { %v859_v0 = vmul.f32 %v1189_v27, %v743_v1  ;;  %v860_v18 = vmul.f32 %v1190_v10, %v743_v1  ;;  %1014 = vmatpush.msra.mxu1 %v955_v24  ;;  %1060 = vmatpush.msra.mxu3 %v956_v32  ;;  %v852_v27 = vmul.f32 %v1182_v42, %v727_v8  ;;  %v787_v55 = vpop.permute.xlu0 %786 }
 0x161   :  { %v881_v23 = vmul.f32 %v1211_v22, %v787_v55  ;;  %v882_v48 = vmul.f32 %v1212_v14, %v787_v55 }
 0x162   :  { %v923_v49 = vadd.f32 %v859_v0, %v2522_v11  ;;  %v924_v4 = vadd.f32 %v860_v18, %v2523_v47  ;;  %v723_v13 = vpop.permute.xlu2 %722  ;;  %v915_v0 = vadd.f32 %v851_v25, %v2536_v41  ;;  %v2537_v18 = vld [vmem:[#allocation25_spill] sm:$0xff]  ;;  %v1213_v11 = vld [vmem:[%s2458_s1 + $0x510] sm:$0xff]  ;;  %v2538_v47 = vld [vmem:[#allocation12_spill] sm:$0xff] }
 0x163   :  { %v849_v24 = vmul.f32 %v1179_v21, %v723_v13  ;;  %v850_v12 = vmul.f32 %v1180_v19, %v723_v13  ;;  %v916_v5 = vadd.f32 %v852_v27, %v2537_v18  ;;  %v946_v26 = vadd.f32 %v882_v48, %v2543_v29 }
 0x164   :  { %991 = vmatpush.msra.mxu0 %v923_v49  ;;  %1037 = vmatpush.msra.mxu2 %v924_v4  ;;  %v1214_v49 = vld [vmem:[%s2458_s1 + $0x518] sm:$0xff] }
 0x165   :  { %v913_v4 = vadd.f32 %v849_v24, %v2538_v47  ;;  %v914_v31 = vadd.f32 %v850_v12, %v2539_v52 }
 0x166   :  { %992 = vmatpush.msra.mxu0 %v921_v38  ;;  %1038 = vmatpush.msra.mxu2 %v922_v44  ;;  %v977_v38 = vld [vmem:[%s2457_s0] sm:$0xff] }
 0x167   :  { %v803_v59 = vpop.permute.xlu1 %802 }
 0x168   :  { %v889_v3 = vmul.f32 %v1219_v39, %v803_v59  ;;  %v890_v20 = vmul.f32 %v1220_v34, %v803_v59  ;;  %993 = vmatpush.msra.mxu0 %v919_v35  ;;  %1039 = vmatpush.msra.mxu2 %v920_v53  ;;  %v2540_v34 = vld [vmem:[#allocation28_spill] sm:$0xff]  ;;  %v2541_v35 = vld [vmem:[#allocation29_spill] sm:$0xff]  ;;  %v978_v59 = vld [vmem:[%s2457_s0 + $0x8] sm:$0xff] }
 0x169   :  { %v2542_v53 = vld [vmem:[#allocation32_spill] sm:$0xff] }
 0x16a   :  { %v953_v46 = vadd.f32 %v889_v3, %v2528_v45  ;;  %v954_v16 = vadd.f32 %v890_v20, %v2529_v43  ;;  %v945_v36 = vadd.f32 %v881_v23, %v2542_v53  ;;  %v980_v3 = vld [vmem:[%s2457_s0 + $0x18] sm:$0xff]  ;;  %s1103_s0 = sshll.u32 %s2460_s3, 4  ;;  %s1104_s0 = int_to_ptr.hbm [resolvable:$true] %s1103_s0 }
 0x16c   :  { %1015 = vmatpush.msra.mxu1 %v953_v46  ;;  %1061 = vmatpush.msra.mxu3 %v954_v16 }
 0x16e   :  { %1016 = vmatpush.msra.mxu1 %v951_v2  ;;  %1062 = vmatpush.msra.mxu3 %v952_v6 }
 0x16f   :  { %v731_v58 = vpop.permute.xlu1 %730 }
 0x170   :  { %v853_v10 = vmul.f32 %v1183_v50, %v731_v58  ;;  %v854_v60 = vmul.f32 %v1184_v56, %v731_v58  ;;  %1017 = vmatpush.msra.mxu1 %v949_v30  ;;  %1063 = vmatpush.msra.mxu3 %v950_v61 }
 0x172   :  { %v917_v1 = vadd.f32 %v853_v10, %v2534_v15  ;;  %v918_v32 = vadd.f32 %v854_v60, %v2535_v40 }
 0x174   :  { %994 = vmatpush.msra.mxu0 %v917_v1  ;;  %1040 = vmatpush.msra.mxu2 %v918_v32 }
 0x176   :  { %995 = vmatpush.msra.mxu0 %v915_v0  ;;  %1041 = vmatpush.msra.mxu2 %v916_v5 }
 0x177   :  { %v791_v44 = vpop.permute.xlu1 %790 }
 0x178   :  { %v883_v57 = vmul.f32 %v1213_v11, %v791_v44  ;;  %v884_v39 = vmul.f32 %v1214_v49, %v791_v44  ;;  %996 = vmatpush.msra.mxu0 %v913_v4  ;;  %1042 = vmatpush.msra.mxu2 %v914_v31 }
 0x179   :  { %1043 = vmatmul.f32.vlgmr.msra.gmra.mxu2 %v977_v38  ;;  %997 = vmatmul.f32.vlgmr.msra.gmra.mxu0 %v977_v38 }
 0x17a   :  { %v947_v63 = vadd.f32 %v883_v57, %v2540_v34  ;;  %v948_v37 = vadd.f32 %v884_v39, %v2541_v35 }
 0x17c   :  { %1018 = vmatpush.msra.mxu1 %v947_v63  ;;  %1064 = vmatpush.msra.mxu3 %v948_v37 }
 0x17e   :  { %1019 = vmatpush.msra.mxu1 %v945_v36  ;;  %1065 = vmatpush.msra.mxu3 %v946_v26 }
 0x17f   :  { %1066 = vmatmul.f32.vlgmr.msra.gmra.mxu3 %v978_v59  ;;  %1020 = vmatmul.f32.vlgmr.msra.gmra.mxu1 %v978_v59 }
 0x181   :  { %1046 = vmatmul.f32.gmra.mxu2 %v979_v17  ;;  %1000 = vmatmul.f32.gmra.mxu0 %v979_v17 }
 0x187   :  { %1069 = vmatmul.f32.gmra.mxu3 %v980_v3  ;;  %1023 = vmatmul.f32.gmra.mxu1 %v980_v3 }
 0x1f6   :  { %v998_v20 = vpop.f32.mrf.mxu0 }
 0x1fc   :  { %v1021_v7 = vpop.f32.mrf.mxu1  ;;  %v1044_v8 = vpop.f32.mrf.mxu2 }
 0x1fd   :  { %v1022_v54 = vadd.f32 %v1021_v7, %v998_v20 }
 0x1fe   :  { %v1001_v46 = vpop.f32.mrf.mxu0 }
 0x1ff   :  { %1077 = vst [vmem:[#allocation2] sm:$0xff] %v1022_v54 }
 0x202   :  { %v1067_v45 = vpop.f32.mrf.mxu3 }
 0x203   :  { %v1068_v43 = vadd.f32 %v1067_v45, %v1044_v8 }
 0x204   :  { %v1024_v16 = vpop.f32.mrf.mxu1  ;;  %v1047_v62 = vpop.f32.mrf.mxu2 }
 0x205   :  { %1078 = vst [vmem:[#allocation2 + $0x8] sm:$0xff] %v1068_v43  ;;  %v1025_v28 = vadd.f32 %v1024_v16, %v1001_v46 }
 0x207   :  { %1079 = vst [vmem:[#allocation2 + $0x10] sm:$0xff] %v1025_v28 }
 0x20a   :  { %v1070_v2 = vpop.f32.mrf.mxu3 }
 0x20b   :  { %v1071_v33 = vadd.f32 %v1070_v2, %v1047_v62 }
 0x20d   :  { %1080 = vst [vmem:[#allocation2 + $0x18] sm:$0xff] %v1071_v33 }
 0x20e   :  { %1109 = dma.vmem_to_hbm [thread:$0]  %s1102_s2, 512, %s1104_s0, [#allocation3], %s1288_s24, %s1288_s24, %s1289_s25  }
 0x20f   :  { %1282 = dma.done.wait [#allocation3], 512  }
 0x210   :  { %1283 = vsyncadd [#allocation3], 4294966784 }
 0x211   :  { %1114 = vsyncpa [#allocation3], 1 }

</bundles_post_ra>
